<compile_context>
chip_gen: v7x
topology: tpu7x:2x2x1
jax: 0.10.0
libtpu: 0.0.40
codegen_flags: <defaults>
</compile_context>

<pallas_src>
from functools import partial

import jax
import jax.numpy as jnp
from jax.experimental import pallas as pl
from jax.experimental.pallas import tpu as pltpu


def _round_up(x, m):
    return ((x + m - 1) // m) * m


_BATCH_PARALLEL_MIN = 1024   # rows; below this, stay gridless (1 invocation)
_BATCH_TILE = 128            # batch block when the parallel grid is used


def _net_kernel(x_ref, w1_ref, b1_ref, w2_ref, b2_ref, out_ref):
    # Fused MLP, fully VMEM-resident: (x @ W1 + b1) -> ReLU -> (@ W2 + b2).
    # bf16 MXU operands, f32 accumulation / biases / lane-dense f32 store.
    h = jnp.dot(x_ref[...], w1_ref[...],
                preferred_element_type=jnp.float32)          # [Bt, Hp] f32
    h = jnp.maximum(h + b1_ref[...], 0.0)                    # ReLU (pad cols stay 0)
    y = jnp.dot(h.astype(w2_ref.dtype), w2_ref[...],
                preferred_element_type=jnp.float32)          # [Bt, Ap] f32
    out_ref[...] = y + b2_ref[...]                           # full-tile unmasked vst


def init_params(key, states_dim, actions_num, hidden=50):
    """Mirror the PyTorch module init:
       weights ~ N(0, 0.1); biases ~ default Linear U(-1/sqrt(fan_in), +1/sqrt(fan_in)).
       Weights stored pre-transposed: [in_features, out_features]."""
    k1, k2, k3, k4 = jax.random.split(key, 4)
    w1 = 0.1 * jax.random.normal(k1, (states_dim, hidden), dtype=jnp.float32)
    w2 = 0.1 * jax.random.normal(k2, (hidden, actions_num), dtype=jnp.float32)
    bound1 = 1.0 / jnp.sqrt(jnp.float32(states_dim))
    bound2 = 1.0 / jnp.sqrt(jnp.float32(hidden))
    b1 = jax.random.uniform(k3, (1, hidden), minval=-bound1, maxval=bound1,
                            dtype=jnp.float32)
    b2 = jax.random.uniform(k4, (1, actions_num), minval=-bound2, maxval=bound2,
                            dtype=jnp.float32)
    return w1, b1, w2, b2


def prepare_params(w1, b1, w2, b2, compute_dtype=jnp.bfloat16):
    """Pad + cast parameters ONCE (at init / on param update), not per call.
    Weights go to `compute_dtype` for the MXU; biases stay f32.
    Lane dims (H, A) pad to 128; w1's contraction dim pads only to the sublane
    packing (16 rows for bf16, 8 for f32). Zero padding is exact:
      - padded x cols hit zero rows of w1,
      - padded hidden cols are relu(0 + 0) = 0 and hit zero rows of w2,
      - padded output cols / batch rows are sliced off in the wrapper."""
    S, H = w1.shape
    A = w2.shape[1]
    sub = 16 if jnp.dtype(compute_dtype).itemsize == 2 else 8
    S_pad = _round_up(S, sub)
    H_pad = _round_up(H, 128)
    A_pad = _round_up(A, 128)
    f32 = jnp.float32
    w1_p = jnp.zeros((S_pad, H_pad), compute_dtype).at[:S, :H].set(
        w1.astype(compute_dtype))
    b1_p = jnp.zeros((1, H_pad), f32).at[:, :H].set(b1.astype(f32))
    w2_p = jnp.zeros((H_pad, A_pad), compute_dtype).at[:H, :A].set(
        w2.astype(compute_dtype))
    b2_p = jnp.zeros((1, A_pad), f32).at[:, :A].set(b2.astype(f32))
    # TODO(synk): if states_dim grows large, the H=50->128 lane padding of w1
    # (2.56x HBM inflation) becomes the dominant DMA cost -- revisit layout then.
    return w1_p, b1_p, w2_p, b2_p


@partial(jax.jit, static_argnames=("actions_num",))
def net_forward(x, w1_p, b1_p, w2_p, b2_p, *, actions_num):
    """x: [B, S] f32; pre-padded params from prepare_params() -> [B, actions_num] f32."""
    B, S = x.shape
    S_pad, H_pad = w1_p.shape
    A_pad = w2_p.shape[1]
    compute_dtype = w1_p.dtype
    f32 = jnp.float32

    use_grid = B >= _BATCH_PARALLEL_MIN
    B_pad = _round_up(B, _BATCH_TILE if use_grid else 8)

    # The only per-call data prep: one fused cast (+pad, only if needed) of x.
    x_c = x.astype(compute_dtype)
    if (B_pad, S_pad) != (B, S):
        x_c = jnp.pad(x_c, ((0, B_pad - B), (0, S_pad - S)))

    out_shape = jax.ShapeDtypeStruct((B_pad, A_pad), f32)

    if not use_grid:
        # Gridless: single invocation, everything resident in VMEM, no pipeline
        # scaffolding. Full-array VMEM operands are exempt from the (8,128)
        # block rule, so S stays unpadded (no 4x over-padded x DMA).
        vmem = pl.BlockSpec(memory_space=pltpu.MemorySpace.VMEM)
        out_p = pl.pallas_call(
            _net_kernel,
            out_shape=out_shape,
            in_specs=[vmem, vmem, vmem, vmem, vmem],
            out_specs=vmem,
        )(x_c, w1_p, b1_p, w2_p, b2_p)
    else:
        # Large batch: 1-D "parallel" grid over batch so both TensorCores on a
        # v7x chip split the work (harmless single-core loop on v5e/v6e).
        grid = (B_pad // _BATCH_TILE,)
        out_p = pl.pallas_call(
            _net_kernel,
            out_shape=out_shape,
            grid_spec=pltpu.PrefetchScalarGridSpec(
                num_scalar_prefetch=0,
                grid=grid,
                in_specs=[
                    pl.BlockSpec((_BATCH_TILE, S_pad), lambda i: (i, 0)),
                    pl.BlockSpec((S_pad, H_pad), lambda i: (0, 0)),
                    pl.BlockSpec((1, H_pad), lambda i: (0, 0)),
                    pl.BlockSpec((H_pad, A_pad), lambda i: (0, 0)),
                    pl.BlockSpec((1, A_pad), lambda i: (0, 0)),
                ],
                out_specs=pl.BlockSpec((_BATCH_TILE, A_pad), lambda i: (i, 0)),
            ),
            compiler_params=pltpu.CompilerParams(
                dimension_semantics=("parallel",)),
        )(x_c, w1_p, b1_p, w2_p, b2_p)

    # TODO(synk): if states_dim grows so S_pad*H_pad*2B exceeds a few MiB, tile
    # the contraction (last grid axis "arbitrary", f32 VMEM accumulator with
    # pl.when init/finalize), sizing the K tile for v7x's 64 MiB VMEM first.
    # The [:B, :A] slice is one tiny extra launch; keep A_pad=128 (unmasked
    # lane-dense store) and slice at the consumer instead if it ever matters.
    return out_p[:B, :actions_num]


if __name__ == "__main__":
    key = jax.random.PRNGKey(0)
    kx, kp = jax.random.split(key)

    # Batch many states per call so launch/DMA cost is amortized; the model is tiny.
    batch = 256
    states_dim = 32     # Mamadroid family-level state dim is small
    actions_num = 4
    hidden = 50

    x = jax.random.normal(kx, (batch, states_dim), dtype=jnp.float32)
    w1, b1, w2, b2 = init_params(kp, states_dim, actions_num, hidden)

    # Pad / cast parameters ONCE, outside the per-call forward (perf review #1).
    params = jax.block_until_ready(prepare_params(w1, b1, w2, b2))

    out = net_forward(x, *params, actions_num=actions_num)
    out = jax.block_until_ready(out)

    # Pure-JAX f32 reference of the module semantics. The kernel uses bf16 MXU
    # operands (f32 accumulation), so the tolerance is loosened per the review.
    ref = jnp.maximum(x @ w1 + b1, 0.0) @ w2 + b2
    assert out.shape == (batch, actions_num)
    assert jnp.allclose(out, ref, atol=5e-2, rtol=5e-2), float(
        jnp.max(jnp.abs(out - ref)))

    print("KERNEL_OK")
</pallas_src>

<mosaic_0001>
module attributes {stable_mosaic.version = 11 : i64} {
  func.func @_net_kernel(%arg0: memref<256x32xbf16, #tpu.memory_space<vmem>>, %arg1: memref<32x128xbf16, #tpu.memory_space<vmem>>, %arg2: memref<1x128xf32, #tpu.memory_space<vmem>>, %arg3: memref<128x128xbf16, #tpu.memory_space<vmem>>, %arg4: memref<1x128xf32, #tpu.memory_space<vmem>>, %arg5: memref<256x128xf32, #tpu.memory_space<vmem>>) attributes {dimension_semantics = [], scalar_prefetch = 0 : i64, scratch_operands = 0 : i64, tpu.core_type = #tpu.core_type<tc>} {
    %c0 = arith.constant 0 : index
    %c0_0 = arith.constant 0 : index
    %0 = vector.load %arg0[%c0, %c0_0] : memref<256x32xbf16, #tpu.memory_space<vmem>>, vector<256x32xbf16>
    %c0_1 = arith.constant 0 : index
    %c0_2 = arith.constant 0 : index
    %1 = vector.load %arg1[%c0_1, %c0_2] : memref<32x128xbf16, #tpu.memory_space<vmem>>, vector<32x128xbf16>
    %cst = arith.constant dense<0.000000e+00> : vector<256x128xf32>
    %2 = tpu.matmul %0, %1, %cst {dimension_numbers = #tpu.dot_dimension_numbers<[1], [0], [0], [1], [0, 0, 1, 1], [], []>} : vector<256x32xbf16>, vector<32x128xbf16>, vector<256x128xf32> -> vector<256x128xf32>
    %c0_3 = arith.constant 0 : index
    %c0_4 = arith.constant 0 : index
    %3 = vector.load %arg2[%c0_3, %c0_4] : memref<1x128xf32, #tpu.memory_space<vmem>>, vector<1x128xf32>
    %4 = vector.broadcast %3 : vector<1x128xf32> to vector<256x128xf32>
    %5 = arith.addf %2, %4 : vector<256x128xf32>
    %cst_5 = arith.constant 0.000000e+00 : f32
    %6 = vector.broadcast %cst_5 : f32 to vector<256x128xf32>
    %7 = arith.maximumf %5, %6 : vector<256x128xf32>
    %8 = arith.truncf %7 : vector<256x128xf32> to vector<256x128xbf16>
    %c0_6 = arith.constant 0 : index
    %c0_7 = arith.constant 0 : index
    %9 = vector.load %arg3[%c0_6, %c0_7] : memref<128x128xbf16, #tpu.memory_space<vmem>>, vector<128x128xbf16>
    %cst_8 = arith.constant dense<0.000000e+00> : vector<256x128xf32>
    %10 = tpu.matmul %8, %9, %cst_8 {dimension_numbers = #tpu.dot_dimension_numbers<[1], [0], [0], [1], [0, 0, 1, 1], [], []>} : vector<256x128xbf16>, vector<128x128xbf16>, vector<256x128xf32> -> vector<256x128xf32>
    %c0_9 = arith.constant 0 : index
    %c0_10 = arith.constant 0 : index
    %11 = vector.load %arg4[%c0_9, %c0_10] : memref<1x128xf32, #tpu.memory_space<vmem>>, vector<1x128xf32>
    %12 = vector.broadcast %11 : vector<1x128xf32> to vector<256x128xf32>
    %13 = arith.addf %10, %12 : vector<256x128xf32>
    %c0_11 = arith.constant 0 : index
    %c0_12 = arith.constant 0 : index
    %14 = vector.load %arg5[%c0_11, %c0_12] : memref<256x128xf32, #tpu.memory_space<vmem>>, vector<256x128xf32>
    tpu.vector_store %arg5[%c0_11, %c0_12], %13 {strides = array<i32>} : memref<256x128xf32, #tpu.memory_space<vmem>>, vector<256x128xf32>,
    return
  }
}

</mosaic_0001>

<bundles_post_ra>
// kernel: net_forward.1
= control target key start
LH: loop header
LB: loop body
LE: loop exit
PB: predicated region body
PF: predicated region fallthrough
CT: control target
= control target key end

     0   :  { %vm156_vm0 = vcmask 261120   ;;  %s1188_s1 = inlined_call_operand.vmem [shape: bf16[32,128], index: 1, kind: input, shape index: {}]   ;;  %s1189_s0 = inlined_call_operand.vmem [shape: bf16[256,32], index: 0, kind: input, shape index: {}]   ;;  %s1190_s3 = inlined_call_operand.vmem [shape: bf16[128,128], index: 3, kind: input, shape index: {}]   ;;  %s1191_s2 = inlined_call_operand.vmem [shape: f32[1,128], index: 2, kind: input, shape index: {}]   ;;  %s1192_s4 = inlined_call_operand.vmem [shape: f32[1,128], index: 4, kind: input, shape index: {}]   ;;  %s1193_s5 = inlined_call_operand.vmem [shape: f32[256,128], index: 5, kind: output, shape index: {}]  }
   0x1   :  { %v868_v0 = vld [vmem:[%s1188_s1] sm:$0xff]   ;;  %v869_v1 = vld [vmem:[%s1188_s1 + $0x8] sm:$0xff]   ;;  %v872_v4 = vld [vmem:[%s1189_s0 + $0x10] sm:$0xff]  }
   0x2   :  { %768 = vmatprep.subr.bf16.mxu0 %v868_v0  ;;  %v870_v2 = vld [vmem:[%s1189_s0] sm:$0xff]   ;;  %v871_v3 = vld [vmem:[%s1189_s0 + $0x8] sm:$0xff]   ;;  %v873_v5 = vld [vmem:[%s1189_s0 + $0x18] sm:$0xff]  }
   0x3   :  { %769 = vmatpush3.bf16.msra.mxu0 %v868_v0  ;;  %772 = vmatprep.mubr.msk.bf16.mxu0 %vm156_vm0, %v870_v2  ;;  %v874_v6 = vld [vmem:[%s1189_s0 + $0x20] sm:$0xff]   ;;  %v887_v8 = vld [vmem:[%s1190_s3 + $0x8] sm:$0xff]   ;;  %v888_v10 = vld [vmem:[%s1190_s3 + $0x10] sm:$0xff]  }
   0x4   :  { %770 = vmatprep.subr.bf16.mxu0 %v869_v1  ;;  %v886_v7 = vld [vmem:[%s1190_s3] sm:$0xff]   ;;  %v875_v9 = vld [vmem:[%s1189_s0 + $0x28] sm:$0xff]   ;;  %v876_v11 = vld [vmem:[%s1189_s0 + $0x30] sm:$0xff]  }
   0x5   :  { %852 = vmatprep.subr.bf16.mxu1 %v886_v7  ;;  %v889_v12 = vld [vmem:[%s1190_s3 + $0x18] sm:$0xff]   ;;  %v890_v14 = vld [vmem:[%s1190_s3 + $0x20] sm:$0xff]   ;;  %v891_v16 = vld [vmem:[%s1190_s3 + $0x28] sm:$0xff]  }
   0x6   :  { %860 = vmatpush3.bf16.msra.mxu1 %v886_v7  ;;  %v877_v13 = vld [vmem:[%s1189_s0 + $0x38] sm:$0xff]   ;;  %v878_v15 = vld [vmem:[%s1189_s0 + $0x40] sm:$0xff]   ;;  %v879_v17 = vld [vmem:[%s1189_s0 + $0x48] sm:$0xff]  }
   0x7   :  { %771 = vmatpush3.bf16.msra.mxu0 %v869_v1  ;;  %853 = vmatprep.subr.bf16.mxu1 %v887_v8  ;;  %v880_v18 = vld [vmem:[%s1189_s0 + $0x50] sm:$0xff]   ;;  %v881_v19 = vld [vmem:[%s1189_s0 + $0x58] sm:$0xff]   ;;  %v882_v20 = vld [vmem:[%s1189_s0 + $0x60] sm:$0xff]  }
   0x8   :  { %804 = vmatprep.subr.bf16.mxu0 %v886_v7  ;;  %v883_v21 = vld [vmem:[%s1189_s0 + $0x68] sm:$0xff]   ;;  %v884_v22 = vld [vmem:[%s1189_s0 + $0x70] sm:$0xff]   ;;  %v885_v23 = vld [vmem:[%s1189_s0 + $0x78] sm:$0xff]  }
   0x9   :  { %v892_v24 = vld [vmem:[%s1190_s3 + $0x30] sm:$0xff]   ;;  %v893_v25 = vld [vmem:[%s1190_s3 + $0x38] sm:$0xff]   ;;  %v1021_v26 = vld [vmem:[%s1191_s2] ss:$0 sm:$0xff] }
   0xa   :  { %773 = vmatmul.mubr.msk.bf16.vlgmr.msra.gmra.mrb[0].mxu0 %vm156_vm0, %v871_v3  ;;  %861 = vmatpush3.bf16.msra.mxu1 %v887_v8 }
   0xb   :  { %776 = vmatprep.mubr.msk.bf16.mxu0 %vm156_vm0, %v872_v4  ;;  %805 = vmatpush3.bf16.msra.mxu0 %v886_v7 }
   0xc   :  { %806 = vmatprep.subr.bf16.mxu0 %v887_v8  ;;  %854 = vmatprep.subr.bf16.mxu1 %v888_v10 }
   0xe   :  { %862 = vmatpush3.bf16.msra.mxu1 %v888_v10 }
   0xf   :  { %807 = vmatpush3.bf16.msra.mxu0 %v887_v8  ;;  %855 = vmatprep.subr.bf16.mxu1 %v889_v12 }
  0x10   :  { %808 = vmatprep.subr.bf16.mxu0 %v888_v10 }
  0x12   :  { %777 = vmatmul.mubr.msk.bf16.gmra.mrb[4].mxu0 %vm156_vm0, %v873_v5  ;;  %863 = vmatpush3.bf16.msra.mxu1 %v889_v12 }
  0x13   :  { %780 = vmatprep.mubr.msk.bf16.mxu0 %vm156_vm0, %v874_v6  ;;  %809 = vmatpush3.bf16.msra.mxu0 %v888_v10 }
  0x14   :  { %810 = vmatprep.subr.bf16.mxu0 %v889_v12  ;;  %856 = vmatprep.subr.bf16.mxu1 %v890_v14 }
  0x16   :  { %864 = vmatpush3.bf16.msra.mxu1 %v890_v14 }
  0x17   :  { %811 = vmatpush3.bf16.msra.mxu0 %v889_v12  ;;  %857 = vmatprep.subr.bf16.mxu1 %v891_v16 }
  0x18   :  { %812 = vmatprep.subr.bf16.mxu0 %v890_v14 }
  0x1a   :  { %781 = vmatmul.mubr.msk.bf16.gmra.mrb[8].mxu0 %vm156_vm0, %v875_v9  ;;  %865 = vmatpush3.bf16.msra.mxu1 %v891_v16 }
  0x1b   :  { %784 = vmatprep.mubr.msk.bf16.mxu0 %vm156_vm0, %v876_v11  ;;  %813 = vmatpush3.bf16.msra.mxu0 %v890_v14 }
  0x1c   :  { %814 = vmatprep.subr.bf16.mxu0 %v891_v16  ;;  %858 = vmatprep.subr.bf16.mxu1 %v892_v24 }
  0x1e   :  { %866 = vmatpush3.bf16.msra.mxu1 %v892_v24 }
  0x1f   :  { %815 = vmatpush3.bf16.msra.mxu0 %v891_v16  ;;  %859 = vmatprep.subr.bf16.mxu1 %v893_v25 }
  0x20   :  { %816 = vmatprep.subr.bf16.mxu0 %v892_v24 }
  0x22   :  { %785 = vmatmul.mubr.msk.bf16.gmra.mrb[12].mxu0 %vm156_vm0, %v877_v13  ;;  %867 = vmatpush3.bf16.msra.mxu1 %v893_v25 }
  0x23   :  { %788 = vmatprep.mubr.msk.bf16.mxu0 %vm156_vm0, %v878_v15  ;;  %817 = vmatpush3.bf16.msra.mxu0 %v892_v24 }
  0x24   :  { %818 = vmatprep.subr.bf16.mxu0 %v893_v25 }
  0x27   :  { %819 = vmatpush3.bf16.msra.mxu0 %v893_v25 }
  0x2a   :  { %789 = vmatmul.mubr.msk.bf16.gmra.mrb[16].mxu0 %vm156_vm0, %v879_v17 }
  0x2b   :  { %792 = vmatprep.mubr.msk.bf16.mxu0 %vm156_vm0, %v880_v18 }
  0x32   :  { %793 = vmatmul.mubr.msk.bf16.gmra.mrb[20].mxu0 %vm156_vm0, %v881_v19 }
  0x33   :  { %796 = vmatprep.mubr.msk.bf16.mxu0 %vm156_vm0, %v882_v20 }
  0x3a   :  { %797 = vmatmul.mubr.msk.bf16.gmra.mrb[24].mxu0 %vm156_vm0, %v883_v21 }
  0x3b   :  { %800 = vmatprep.mubr.msk.bf16.mxu0 %vm156_vm0, %v884_v22 }
  0x42   :  { %801 = vmatmul.mubr.msk.bf16.gmra.mrb[28].mxu0 %vm156_vm0, %v885_v23 }
  0xdd   :  { %v774_v27 = vpop.f32.mrb[0].mxu0 }
  0xde   :  { %v248_v28 = vadd.f32 %v774_v27, %v1021_v26  ;;  %v239_v29 = vpop.f32.mrb[1].mxu0 }
  0xdf   :  { %v240_v30 = vadd.f32 %v1021_v26, %v239_v29  ;;  %v775_v31 = vpop.f32.mrb[2].mxu0 }
  0xe0   :  { %v251_v32 = vadd.f32 %v775_v31, %v1021_v26  ;;  %v242_v33 = vpop.f32.mrb[3].mxu0  ;;  %v368_v35 = vmax.f32 %v248_v28, 0.0 }
  0xe1   :  { %v243_v34 = vadd.f32 %v1021_v26, %v242_v33  ;;  %v366_v37 = vmax.f32 %v240_v30, 0.0 }
  0xe2   :  { %v369_v36 = vmax.f32 %v251_v32, 0.0 }
  0xe3   :  { %v367_v38 = vmax.f32 %v243_v34, 0.0 }
  0xe4   :  { %v399_v39 = vpack.c.bf16 %v369_v36, %v368_v35 }
  0xe5   :  { %v398_v40 = vpack.c.bf16 %v367_v38, %v366_v37  ;;  %v778_v41 = vpop.f32.mrb[4].mxu0 }
  0xe6   :  { %v264_v42 = vadd.f32 %v778_v41, %v1021_v26  ;;  %v255_v43 = vpop.f32.mrb[5].mxu0 }
  0xe7   :  { %v256_v44 = vadd.f32 %v1021_v26, %v255_v43  ;;  %v779_v45 = vpop.f32.mrb[6].mxu0  ;;  %820 = vmatprep.mubr.bf16.mxu0 %v398_v40 }
  0xe8   :  { %v267_v46 = vadd.f32 %v779_v45, %v1021_v26  ;;  %v258_v47 = vpop.f32.mrb[7].mxu0  ;;  %821 = vmatmul.mubr.bf16.vlgmr.msra.gmra.mrb[32].mxu0 %v399_v39  ;;  %v372_v49 = vmax.f32 %v264_v42, 0.0 }
  0xe9   :  { %v259_v48 = vadd.f32 %v1021_v26, %v258_v47  ;;  %v370_v51 = vmax.f32 %v256_v44, 0.0 }
  0xea   :  { %v373_v50 = vmax.f32 %v267_v46, 0.0 }
  0xeb   :  { %v371_v52 = vmax.f32 %v259_v48, 0.0 }
  0xec   :  { %v401_v53 = vpack.c.bf16 %v373_v50, %v372_v49 }
  0xed   :  { %v782_v54 = vpop.f32.mrb[8].mxu0  ;;  %v400_v55 = vpack.c.bf16 %v371_v52, %v370_v51 }
  0xee   :  { %v280_v56 = vadd.f32 %v782_v54, %v1021_v26  ;;  %v271_v57 = vpop.f32.mrb[9].mxu0 }
  0xef   :  { %v272_v58 = vadd.f32 %v1021_v26, %v271_v57  ;;  %v783_v59 = vpop.f32.mrb[10].mxu0  ;;  %824 = vmatprep.mubr.bf16.mxu1 %v400_v55 }
  0xf0   :  { %v283_v60 = vadd.f32 %v783_v59, %v1021_v26  ;;  %v274_v61 = vpop.f32.mrb[11].mxu0  ;;  %825 = vmatmul.mubr.bf16.vlgmr.msra.gmra.mrb[0].mxu1 %v401_v53  ;;  %v376_v63 = vmax.f32 %v280_v56, 0.0 }
  0xf1   :  { %v275_v62 = vadd.f32 %v1021_v26, %v274_v61  ;;  %v374_v1 = vmax.f32 %v272_v58, 0.0 }
  0xf2   :  { %v377_v0 = vmax.f32 %v283_v60, 0.0 }
  0xf3   :  { %v375_v2 = vmax.f32 %v275_v62, 0.0 }
  0xf4   :  { %v403_v3 = vpack.c.bf16 %v377_v0, %v376_v63 }
  0xf5   :  { %v402_v4 = vpack.c.bf16 %v375_v2, %v374_v1  ;;  %v786_v5 = vpop.f32.mrb[12].mxu0 }
  0xf6   :  { %v296_v6 = vadd.f32 %v786_v5, %v1021_v26  ;;  %v287_v7 = vpop.f32.mrb[13].mxu0 }
  0xf7   :  { %v288_v8 = vadd.f32 %v1021_v26, %v287_v7  ;;  %v787_v9 = vpop.f32.mrb[14].mxu0  ;;  %828 = vmatprep.mubr.bf16.mxu1 %v402_v4 }
  0xf8   :  { %v299_v10 = vadd.f32 %v787_v9, %v1021_v26  ;;  %v290_v11 = vpop.f32.mrb[15].mxu0  ;;  %829 = vmatmul.mubr.bf16.gmra.mrb[4].mxu1 %v403_v3  ;;  %v380_v13 = vmax.f32 %v296_v6, 0.0 }
  0xf9   :  { %v291_v12 = vadd.f32 %v1021_v26, %v290_v11  ;;  %v378_v15 = vmax.f32 %v288_v8, 0.0 }
  0xfa   :  { %v381_v14 = vmax.f32 %v299_v10, 0.0 }
  0xfb   :  { %v379_v16 = vmax.f32 %v291_v12, 0.0  ;;  %v1058_v12 = vld [vmem:[%s1192_s4] ss:$0 sm:$0xff] }
  0xfc   :  { %v405_v17 = vpack.c.bf16 %v381_v14, %v380_v13 }
  0xfd   :  { %v404_v18 = vpack.c.bf16 %v379_v16, %v378_v15  ;;  %v790_v19 = vpop.f32.mrb[16].mxu0 }
  0xfe   :  { %v312_v20 = vadd.f32 %v790_v19, %v1021_v26  ;;  %v303_v21 = vpop.f32.mrb[17].mxu0 }
  0xff   :  { %v304_v22 = vadd.f32 %v1021_v26, %v303_v21  ;;  %v791_v23 = vpop.f32.mrb[18].mxu0  ;;  %832 = vmatprep.mubr.bf16.mxu1 %v404_v18 }
 0x100   :  { %v315_v24 = vadd.f32 %v791_v23, %v1021_v26  ;;  %v306_v25 = vpop.f32.mrb[19].mxu0  ;;  %833 = vmatmul.mubr.bf16.gmra.mrb[8].mxu1 %v405_v17  ;;  %v384_v28 = vmax.f32 %v312_v20, 0.0 }
 0x101   :  { %v307_v27 = vadd.f32 %v1021_v26, %v306_v25  ;;  %v382_v30 = vmax.f32 %v304_v22, 0.0 }
 0x102   :  { %v385_v29 = vmax.f32 %v315_v24, 0.0 }
 0x103   :  { %v383_v31 = vmax.f32 %v307_v27, 0.0 }
 0x104   :  { %v407_v32 = vpack.c.bf16 %v385_v29, %v384_v28 }
 0x105   :  { %v406_v33 = vpack.c.bf16 %v383_v31, %v382_v30  ;;  %v794_v34 = vpop.f32.mrb[20].mxu0 }
 0x106   :  { %v328_v35 = vadd.f32 %v794_v34, %v1021_v26  ;;  %v319_v36 = vpop.f32.mrb[21].mxu0 }
 0x107   :  { %v320_v37 = vadd.f32 %v1021_v26, %v319_v36  ;;  %v795_v38 = vpop.f32.mrb[22].mxu0  ;;  %836 = vmatprep.mubr.bf16.mxu1 %v406_v33 }
 0x108   :  { %v331_v39 = vadd.f32 %v795_v38, %v1021_v26  ;;  %v322_v40 = vpop.f32.mrb[23].mxu0  ;;  %837 = vmatmul.mubr.bf16.gmra.mrb[12].mxu1 %v407_v32  ;;  %v388_v42 = vmax.f32 %v328_v35, 0.0 }
 0x109   :  { %v323_v41 = vadd.f32 %v1021_v26, %v322_v40  ;;  %v386_v44 = vmax.f32 %v320_v37, 0.0 }
 0x10a   :  { %v389_v43 = vmax.f32 %v331_v39, 0.0 }
 0x10b   :  { %v387_v45 = vmax.f32 %v323_v41, 0.0 }
 0x10c   :  { %v409_v46 = vpack.c.bf16 %v389_v43, %v388_v42 }
 0x10d   :  { %v408_v47 = vpack.c.bf16 %v387_v45, %v386_v44  ;;  %v798_v48 = vpop.f32.mrb[24].mxu0 }
 0x10e   :  { %v344_v49 = vadd.f32 %v798_v48, %v1021_v26  ;;  %v335_v50 = vpop.f32.mrb[25].mxu0 }
 0x10f   :  { %v336_v51 = vadd.f32 %v1021_v26, %v335_v50  ;;  %v799_v52 = vpop.f32.mrb[26].mxu0  ;;  %840 = vmatprep.mubr.bf16.mxu1 %v408_v47 }
 0x110   :  { %v347_v53 = vadd.f32 %v799_v52, %v1021_v26  ;;  %v338_v54 = vpop.f32.mrb[27].mxu0  ;;  %841 = vmatmul.mubr.bf16.gmra.mrb[16].mxu1 %v409_v46  ;;  %v392_v56 = vmax.f32 %v344_v49, 0.0 }
 0x111   :  { %v339_v55 = vadd.f32 %v1021_v26, %v338_v54  ;;  %v390_v58 = vmax.f32 %v336_v51, 0.0 }
 0x112   :  { %v393_v57 = vmax.f32 %v347_v53, 0.0 }
 0x113   :  { %v391_v59 = vmax.f32 %v339_v55, 0.0 }
 0x114   :  { %v411_v60 = vpack.c.bf16 %v393_v57, %v392_v56 }
 0x115   :  { %v410_v61 = vpack.c.bf16 %v391_v59, %v390_v58  ;;  %v802_v62 = vpop.f32.mrb[28].mxu0 }
 0x116   :  { %v360_v63 = vadd.f32 %v802_v62, %v1021_v26  ;;  %v351_v0 = vpop.f32.mrb[29].mxu0 }
 0x117   :  { %v352_v1 = vadd.f32 %v1021_v26, %v351_v0  ;;  %v803_v2 = vpop.f32.mrb[30].mxu0  ;;  %844 = vmatprep.mubr.bf16.mxu1 %v410_v61 }
 0x118   :  { %v363_v3 = vadd.f32 %v803_v2, %v1021_v26  ;;  %v354_v4 = vpop.f32.mrb[31].mxu0  ;;  %845 = vmatmul.mubr.bf16.gmra.mrb[20].mxu1 %v411_v60  ;;  %v396_v6 = vmax.f32 %v360_v63, 0.0 }
 0x119   :  { %v355_v5 = vadd.f32 %v1021_v26, %v354_v4  ;;  %v394_v8 = vmax.f32 %v352_v1, 0.0 }
 0x11a   :  { %v397_v7 = vmax.f32 %v363_v3, 0.0 }
 0x11b   :  { %v395_v9 = vmax.f32 %v355_v5, 0.0 }
 0x11c   :  { %v413_v10 = vpack.c.bf16 %v397_v7, %v396_v6 }
 0x11d   :  { %v412_v11 = vpack.c.bf16 %v395_v9, %v394_v8 }
 0x11f   :  { %848 = vmatprep.mubr.bf16.mxu1 %v412_v11 }
 0x120   :  { %849 = vmatmul.mubr.bf16.gmra.mrb[24].mxu1 %v413_v10 }
 0x1bb   :  { %v822_v13 = vpop.f32.mrb[32].mxu0 }
 0x1bc   :  { %v528_v14 = vadd.f32 %v822_v13, %v1058_v12  ;;  %v519_v15 = vpop.f32.mrb[33].mxu0 }
 0x1bd   :  { %v520_v16 = vadd.f32 %v1058_v12, %v519_v15  ;;  %v823_v26 = vpop.f32.mrb[34].mxu0 }
 0x1be   :  { %648 = vst [vmem:[%s1193_s5 + $0x10] sm:$0xff] %v528_v14  ;;  %v531_v17 = vadd.f32 %v823_v26, %v1058_v12  ;;  %v522_v18 = vpop.f32.mrb[35].mxu0 }
 0x1bf   :  { %646 = vst [vmem:[%s1193_s5] sm:$0xff] %v520_v16  ;;  %v523_v19 = vadd.f32 %v1058_v12, %v522_v18 }
 0x1c0   :  { %649 = vst [vmem:[%s1193_s5 + $0x18] sm:$0xff] %v531_v17 }
 0x1c1   :  { %647 = vst [vmem:[%s1193_s5 + $0x8] sm:$0xff] %v523_v19 }
 0x1c3   :  { %v826_v20 = vpop.f32.mrb[0].mxu1 }
 0x1c4   :  { %v544_v21 = vadd.f32 %v826_v20, %v1058_v12  ;;  %v535_v22 = vpop.f32.mrb[1].mxu1 }
 0x1c5   :  { %v536_v23 = vadd.f32 %v1058_v12, %v535_v22  ;;  %v827_v24 = vpop.f32.mrb[2].mxu1 }
 0x1c6   :  { %652 = vst [vmem:[%s1193_s5 + $0x30] sm:$0xff] %v544_v21  ;;  %v547_v25 = vadd.f32 %v827_v24, %v1058_v12  ;;  %v538_v27 = vpop.f32.mrb[3].mxu1 }
 0x1c7   :  { %650 = vst [vmem:[%s1193_s5 + $0x20] sm:$0xff] %v536_v23  ;;  %v539_v28 = vadd.f32 %v1058_v12, %v538_v27 }
 0x1c8   :  { %653 = vst [vmem:[%s1193_s5 + $0x38] sm:$0xff] %v547_v25 }
 0x1c9   :  { %651 = vst [vmem:[%s1193_s5 + $0x28] sm:$0xff] %v539_v28 }
 0x1cb   :  { %v830_v29 = vpop.f32.mrb[4].mxu1 }
 0x1cc   :  { %v560_v30 = vadd.f32 %v830_v29, %v1058_v12  ;;  %v551_v31 = vpop.f32.mrb[5].mxu1 }
 0x1cd   :  { %v552_v32 = vadd.f32 %v1058_v12, %v551_v31  ;;  %v831_v33 = vpop.f32.mrb[6].mxu1 }
 0x1ce   :  { %656 = vst [vmem:[%s1193_s5 + $0x50] sm:$0xff] %v560_v30  ;;  %v563_v34 = vadd.f32 %v831_v33, %v1058_v12  ;;  %v554_v35 = vpop.f32.mrb[7].mxu1 }
 0x1cf   :  { %654 = vst [vmem:[%s1193_s5 + $0x40] sm:$0xff] %v552_v32  ;;  %v555_v36 = vadd.f32 %v1058_v12, %v554_v35 }
 0x1d0   :  { %657 = vst [vmem:[%s1193_s5 + $0x58] sm:$0xff] %v563_v34 }
 0x1d1   :  { %655 = vst [vmem:[%s1193_s5 + $0x48] sm:$0xff] %v555_v36 }
 0x1d3   :  { %v834_v37 = vpop.f32.mrb[8].mxu1 }
 0x1d4   :  { %v576_v38 = vadd.f32 %v834_v37, %v1058_v12  ;;  %v567_v39 = vpop.f32.mrb[9].mxu1 }
 0x1d5   :  { %v568_v40 = vadd.f32 %v1058_v12, %v567_v39  ;;  %v835_v41 = vpop.f32.mrb[10].mxu1 }
 0x1d6   :  { %660 = vst [vmem:[%s1193_s5 + $0x70] sm:$0xff] %v576_v38  ;;  %v579_v42 = vadd.f32 %v835_v41, %v1058_v12  ;;  %v570_v43 = vpop.f32.mrb[11].mxu1 }
 0x1d7   :  { %658 = vst [vmem:[%s1193_s5 + $0x60] sm:$0xff] %v568_v40  ;;  %v571_v44 = vadd.f32 %v1058_v12, %v570_v43 }
 0x1d8   :  { %661 = vst [vmem:[%s1193_s5 + $0x78] sm:$0xff] %v579_v42 }
 0x1d9   :  { %659 = vst [vmem:[%s1193_s5 + $0x68] sm:$0xff] %v571_v44 }
 0x1db   :  { %v838_v45 = vpop.f32.mrb[12].mxu1 }
 0x1dc   :  { %v592_v46 = vadd.f32 %v838_v45, %v1058_v12  ;;  %v583_v47 = vpop.f32.mrb[13].mxu1 }
 0x1dd   :  { %v584_v48 = vadd.f32 %v1058_v12, %v583_v47  ;;  %v839_v49 = vpop.f32.mrb[14].mxu1 }
 0x1de   :  { %664 = vst [vmem:[%s1193_s5 + $0x90] sm:$0xff] %v592_v46  ;;  %v595_v50 = vadd.f32 %v839_v49, %v1058_v12  ;;  %v586_v51 = vpop.f32.mrb[15].mxu1 }
 0x1df   :  { %662 = vst [vmem:[%s1193_s5 + $0x80] sm:$0xff] %v584_v48  ;;  %v587_v52 = vadd.f32 %v1058_v12, %v586_v51 }
 0x1e0   :  { %665 = vst [vmem:[%s1193_s5 + $0x98] sm:$0xff] %v595_v50 }
 0x1e1   :  { %663 = vst [vmem:[%s1193_s5 + $0x88] sm:$0xff] %v587_v52 }
 0x1e3   :  { %v842_v53 = vpop.f32.mrb[16].mxu1 }
 0x1e4   :  { %v608_v54 = vadd.f32 %v842_v53, %v1058_v12  ;;  %v599_v55 = vpop.f32.mrb[17].mxu1 }
 0x1e5   :  { %v600_v56 = vadd.f32 %v1058_v12, %v599_v55  ;;  %v843_v57 = vpop.f32.mrb[18].mxu1 }
 0x1e6   :  { %668 = vst [vmem:[%s1193_s5 + $0xb0] sm:$0xff] %v608_v54  ;;  %v611_v58 = vadd.f32 %v843_v57, %v1058_v12  ;;  %v602_v59 = vpop.f32.mrb[19].mxu1 }
 0x1e7   :  { %666 = vst [vmem:[%s1193_s5 + $0xa0] sm:$0xff] %v600_v56  ;;  %v603_v60 = vadd.f32 %v1058_v12, %v602_v59 }
 0x1e8   :  { %669 = vst [vmem:[%s1193_s5 + $0xb8] sm:$0xff] %v611_v58 }
 0x1e9   :  { %667 = vst [vmem:[%s1193_s5 + $0xa8] sm:$0xff] %v603_v60 }
 0x1eb   :  { %v846_v61 = vpop.f32.mrb[20].mxu1 }
 0x1ec   :  { %v624_v62 = vadd.f32 %v846_v61, %v1058_v12  ;;  %v615_v63 = vpop.f32.mrb[21].mxu1 }
 0x1ed   :  { %v616_v0 = vadd.f32 %v1058_v12, %v615_v63  ;;  %v847_v1 = vpop.f32.mrb[22].mxu1 }
 0x1ee   :  { %672 = vst [vmem:[%s1193_s5 + $0xd0] sm:$0xff] %v624_v62  ;;  %v627_v2 = vadd.f32 %v847_v1, %v1058_v12  ;;  %v618_v3 = vpop.f32.mrb[23].mxu1 }
 0x1ef   :  { %670 = vst [vmem:[%s1193_s5 + $0xc0] sm:$0xff] %v616_v0  ;;  %v619_v4 = vadd.f32 %v1058_v12, %v618_v3 }
 0x1f0   :  { %673 = vst [vmem:[%s1193_s5 + $0xd8] sm:$0xff] %v627_v2 }
 0x1f1   :  { %671 = vst [vmem:[%s1193_s5 + $0xc8] sm:$0xff] %v619_v4 }
 0x1f3   :  { %v850_v5 = vpop.f32.mrb[24].mxu1 }
 0x1f4   :  { %v640_v6 = vadd.f32 %v850_v5, %v1058_v12  ;;  %v631_v7 = vpop.f32.mrb[25].mxu1 }
 0x1f5   :  { %v632_v8 = vadd.f32 %v1058_v12, %v631_v7  ;;  %v851_v9 = vpop.f32.mrb[26].mxu1 }
 0x1f6   :  { %676 = vst [vmem:[%s1193_s5 + $0xf0] sm:$0xff] %v640_v6  ;;  %v643_v10 = vadd.f32 %v851_v9, %v1058_v12  ;;  %v634_v11 = vpop.f32.mrb[27].mxu1 }
 0x1f7   :  { %674 = vst [vmem:[%s1193_s5 + $0xe0] sm:$0xff] %v632_v8  ;;  %v635_v13 = vadd.f32 %v1058_v12, %v634_v11 }
 0x1f8   :  { %677 = vst [vmem:[%s1193_s5 + $0xf8] sm:$0xff] %v643_v10 }
 0x1f9   :  { %675 = vst [vmem:[%s1193_s5 + $0xe8] sm:$0xff] %v635_v13 }

</bundles_post_ra>
